<compile_context>
chip_gen: v6e
topology: v6e:2x2x1
jax: 0.10.0
libtpu: 0.0.40
codegen_flags: <defaults>
</compile_context>

<pallas_src>
import math

import jax
import jax.numpy as jnp
import numpy as np
from jax.experimental import pallas as pl
from jax.experimental.pallas import tpu as pltpu


# ----------------------------- helpers ---------------------------------------

def _round_up(x, m):
    return ((x + m - 1) // m) * m


def _sublane_quantum(dtype):
    # full-vreg sublane quantum: 8 for f32, 16 for bf16/f16, 32 for int8/fp8
    return max(8, 32 // jnp.dtype(dtype).itemsize)


def _vmem_capacity_bytes():
    """Real per-core VMEM capacity (v5e/v6e: 128 MiB, v7x: 64 MiB)."""
    try:
        info = pltpu.get_tpu_info()
        cap = getattr(info, "vmem_capacity_bytes", None)
        if cap:
            return int(cap)
    except Exception:
        pass
    return 64 * 1024 * 1024  # conservative fallback (v7x floor) - safe everywhere


def _derive_tiles(m, hidden, inter, x_dtype, w_dtype, out_dtype,
                  *, tm_pref=256, ti_pref=512, vmem_budget=None):
    """Pick (tm, ti) so the full double-buffered footprint fits in real VMEM."""
    xb = jnp.dtype(x_dtype).itemsize
    wb = jnp.dtype(w_dtype).itemsize
    ob = jnp.dtype(out_dtype).itemsize
    needs_acc = jnp.dtype(out_dtype) != jnp.dtype(jnp.float32)
    if vmem_budget is None:
        vmem_budget = int(0.70 * _vmem_capacity_bytes())  # headroom for compiler

    q = _sublane_quantum(x_dtype)
    tm = min(_round_up(tm_pref, q), _round_up(max(m, 1), q))
    ti = min(_round_up(ti_pref, 128), _round_up(max(inter, 1), 128))

    def footprint(tm_, ti_):
        x_buf = 2 * tm_ * hidden * xb                    # double-buffered x tile
        w_buf = 2 * 3 * hidden * ti_ * wb                # [up|gate] (H,2ti) + down (ti,H)
        o_buf = 2 * tm_ * hidden * ob                    # double-buffered output tile
        acc = tm_ * hidden * 4 if needs_acc else 0       # f32 accumulator scratch
        tmp = tm_ * ti_ * (8 + 4 + wb) + tm_ * hidden * 4  # ug/h/h_cast/contrib temps
        return x_buf + w_buf + o_buf + acc + tmp

    # Shrink the weight tile first, then token tile, alternating so neither
    # collapses prematurely (v7x with big hidden lands around tm=128, ti=256).
    while footprint(tm, ti) > vmem_budget:
        if ti > 256:
            ti -= 128
        elif tm > max(128, q):
            tm = _round_up(max(q, tm // 2), q)
        elif ti > 128:
            ti -= 128
        elif tm > q:
            tm = _round_up(max(q, tm // 2), q)
        else:
            break
    return tm, ti, footprint(tm, ti)


def _fuse_and_pad_weights(w_up, w_gate, w_down, ti):
    """Pad intermediate to a multiple of ti (zeros are inert) and pre-chunk:
         w_upgate_chunks : (n, H, 2*ti)   chunk j = [up[:, j*ti:(j+1)*ti] | gate[...]]
         w_down_chunks   : (n, ti, H)
       so each grid step fetches one contiguous slab per weight."""
    hidden, inter = w_up.shape
    inter_pad = _round_up(inter, ti)
    pad = inter_pad - inter
    if pad:
        w_up = jnp.pad(w_up, ((0, 0), (0, pad)))
        w_gate = jnp.pad(w_gate, ((0, 0), (0, pad)))
        w_down = jnp.pad(w_down, ((0, pad), (0, 0)))
    n = inter_pad // ti
    up_c = w_up.reshape(hidden, n, ti)
    gate_c = w_gate.reshape(hidden, n, ti)
    w_upgate = jnp.concatenate([up_c, gate_c], axis=2)     # (H, n, 2*ti)
    w_upgate = jnp.transpose(w_upgate, (1, 0, 2))          # (n, H, 2*ti)
    w_down_c = w_down.reshape(n, ti, hidden)               # (n, ti, H) contiguous
    return w_upgate, w_down_c


# ----------------------------- Pallas kernels ---------------------------------

def _tile_contrib(x_ref, wug_ref, wd_ref):
    """Partial down-proj contribution of one intermediate tile, in f32."""
    ti = wd_ref.shape[1]
    x = x_ref[...]
    # one MXU dot with N = 2*ti covering both up_proj and gate_proj
    ug = jnp.dot(x, wug_ref[0], preferred_element_type=jnp.float32)
    up = ug[:, :ti]      # x1 = up_proj(x)
    gate = ug[:, ti:]    # x2 = gate_proj(x)
    h = gate * (up * jax.nn.sigmoid(up))            # x2 * silu(x1), all f32
    # cast the gated activation to the weight dtype (bf16 MXU fast path)
    return jnp.dot(h.astype(wd_ref.dtype), wd_ref[0],
                   preferred_element_type=jnp.float32)


def _yuan_mlp_kernel_acc(x_ref, wug_ref, wd_ref, o_ref, acc_ref):
    """Sub-f32 outputs: f32 VMEM accumulator, cast once at the end."""
    i = pl.program_id(1)

    @pl.when(i == 0)
    def _():
        acc_ref[...] = jnp.zeros_like(acc_ref)

    acc_ref[...] += _tile_contrib(x_ref, wug_ref, wd_ref)

    @pl.when(i == pl.num_programs(1) - 1)
    def _():
        o_ref[...] = acc_ref[...].astype(o_ref.dtype)


def _yuan_mlp_kernel_f32out(x_ref, wug_ref, wd_ref, o_ref):
    """f32 outputs: accumulate directly into the resident output tile."""
    i = pl.program_id(1)
    contrib = _tile_contrib(x_ref, wug_ref, wd_ref)

    @pl.when(i == 0)
    def _():
        o_ref[...] = contrib

    @pl.when(i > 0)
    def _():
        o_ref[...] += contrib


# ----------------------------- launch wrapper ---------------------------------

def _yuan_mlp_fused(x2d, w_upgate_chunks, w_down_chunks, *, tm, ti):
    """x2d: (m, H); w_upgate_chunks: (n, H, 2*ti); w_down_chunks: (n, ti, H)."""
    m, hidden = x2d.shape
    n_chunks, ti_w, hidden_w = w_down_chunks.shape
    assert ti_w == ti and hidden_w == hidden
    assert w_upgate_chunks.shape == (n_chunks, hidden, 2 * ti)
    inter_pad = n_chunks * ti

    out_dtype = x2d.dtype
    f32_out = jnp.dtype(out_dtype) == jnp.dtype(jnp.float32)

    grid = (pl.cdiv(m, tm), n_chunks)

    xb = jnp.dtype(x2d.dtype).itemsize
    wb = jnp.dtype(w_upgate_chunks.dtype).itemsize
    ob = jnp.dtype(out_dtype).itemsize
    n_tm = -(-m // tm)

    flops = 6 * m * hidden * inter_pad            # three matmuls @ 2*M*N*K
    transcendentals = m * inter_pad               # sigmoid
    # weights are re-streamed once per token tile
    bytes_accessed = (m * hidden * (xb + ob)
                      + n_tm * 3 * hidden * inter_pad * wb)

    cap = _vmem_capacity_bytes()
    vmem_limit = int(min(cap, max(int(0.85 * cap), 32 * 1024 * 1024)))

    in_specs = [
        pl.BlockSpec((tm, hidden), lambda mi, ii: (mi, 0)),          # x tile
        pl.BlockSpec((1, hidden, 2 * ti), lambda mi, ii: (ii, 0, 0)),  # [up|gate]
        pl.BlockSpec((1, ti, hidden), lambda mi, ii: (ii, 0, 0)),      # down
    ]
    out_spec = pl.BlockSpec((tm, hidden), lambda mi, ii: (mi, 0))

    if f32_out:
        kernel = _yuan_mlp_kernel_f32out
        scratch = []
    else:
        kernel = _yuan_mlp_kernel_acc
        scratch = [pltpu.VMEM((tm, hidden), jnp.float32)]

    return pl.pallas_call(
        kernel,
        out_shape=jax.ShapeDtypeStruct((m, hidden), out_dtype),
        grid_spec=pltpu.PrefetchScalarGridSpec(
            num_scalar_prefetch=0,
            grid=grid,
            in_specs=in_specs,
            out_specs=out_spec,
            scratch_shapes=scratch,
        ),
        compiler_params=pltpu.CompilerParams(
            dimension_semantics=("parallel", "arbitrary"),
            vmem_limit_bytes=vmem_limit,
        ),
        cost_estimate=pl.CostEstimate(
            flops=flops,
            transcendentals=transcendentals,
            bytes_accessed=bytes_accessed,
        ),
    )(x2d, w_upgate_chunks, w_down_chunks)


def yuan_mlp(x, w_up, w_gate, w_down, *, tm_pref=256, ti_pref=512):
    """Fused YuanMLP forward: (gate_proj(x) * silu(up_proj(x))) @ w_down.

    x       : (..., hidden)
    w_up    : (hidden, intermediate)
    w_gate  : (hidden, intermediate)
    w_down  : (intermediate, hidden)
    returns : (..., hidden) in x.dtype

    NOTE: this convenience entry point fuses/pads the weights per call; for
    repeated use prefer YuanMLPPallas, which does it once at init.
    """
    orig_shape = x.shape
    hidden = orig_shape[-1]
    inter = w_up.shape[1]
    x2d = x.reshape(-1, hidden)
    m = x2d.shape[0]

    tm, ti, _ = _derive_tiles(m, hidden, inter, x2d.dtype, w_up.dtype, x2d.dtype,
                              tm_pref=tm_pref, ti_pref=ti_pref)
    wug, wd = _fuse_and_pad_weights(w_up, w_gate, w_down, ti)
    out = _yuan_mlp_fused(x2d, wug, wd, tm=tm, ti=ti)
    return out.reshape(orig_shape)


# ----------------------------- Module equivalent -----------------------------

class YuanMLPPallas:
    """JAX/Pallas equivalent of vLLM's YuanMLP (bias-free SwiGLU-style MLP)."""

    def __init__(self, hidden_size, intermediate_size, hidden_act="silu",
                 *, dtype=jnp.bfloat16, key=None, tm_pref=256, ti_pref=512):
        if hidden_act != "silu":
            raise ValueError(f"Unsupported activation: {hidden_act}. "
                             "Only silu is supported for now.")
        self.hidden_size = hidden_size
        self.intermediate_size = intermediate_size
        self.dtype = jnp.dtype(dtype)
        if key is None:
            key = jax.random.PRNGKey(0)
        k1, k2, k3 = jax.random.split(key, 3)
        s_in = 1.0 / math.sqrt(hidden_size)
        s_mid = 1.0 / math.sqrt(intermediate_size)
        # stored as (in, out) so forward is a plain x @ W
        self.w_up = (jax.random.normal(k1, (hidden_size, intermediate_size),
                                       dtype=jnp.float32) * s_in).astype(dtype)
        self.w_gate = (jax.random.normal(k2, (hidden_size, intermediate_size),
                                         dtype=jnp.float32) * s_in).astype(dtype)
        self.w_down = (jax.random.normal(k3, (intermediate_size, hidden_size),
                                         dtype=jnp.float32) * s_mid).astype(dtype)

        # Tile sizes derived once from the device's real VMEM capacity
        # (assumes the largest token tile; smaller m only shrinks the footprint).
        self._tm, self._ti, _ = _derive_tiles(
            tm_pref, hidden_size, intermediate_size,
            x_dtype=dtype, w_dtype=dtype, out_dtype=dtype,
            tm_pref=tm_pref, ti_pref=ti_pref)
        # Pad + fuse weights ONCE at init (zero up/gate columns and zero down
        # rows are numerically inert), pre-chunked for contiguous DMAs.
        self.w_upgate_chunks, self.w_down_chunks = _fuse_and_pad_weights(
            self.w_up, self.w_gate, self.w_down, self._ti)

    def __call__(self, x):
        orig_shape = x.shape
        x2d = x.reshape(-1, self.hidden_size)
        m = x2d.shape[0]
        q = _sublane_quantum(x2d.dtype)
        tm = min(self._tm, _round_up(max(m, 1), q))
        out = _yuan_mlp_fused(x2d, self.w_upgate_chunks, self.w_down_chunks,
                              tm=tm, ti=self._ti)
        return out.reshape(orig_shape)


# ----------------------------- Reference (plain JAX) -------------------------

def _reference_mlp(x, w_up, w_gate, w_down, *, gate_round_dtype=None):
    xf = x.astype(jnp.float32)
    up = xf @ w_up.astype(jnp.float32)        # x1
    gate = xf @ w_gate.astype(jnp.float32)    # x2
    h = gate * (up * jax.nn.sigmoid(up))      # x2 * silu(x1)
    if gate_round_dtype is not None:          # mimic the kernel's h-cast before down proj
        h = h.astype(gate_round_dtype).astype(jnp.float32)
    return h @ w_down.astype(jnp.float32)


# ----------------------------- Main ------------------------------------------

if __name__ == "__main__":
    hidden = 32
    intermediate = 64
    batch, seq = 2, 8

    key = jax.random.PRNGKey(0)
    kx, kw = jax.random.split(key)
    x = jax.random.normal(kx, (batch, seq, hidden), dtype=jnp.float32)

    # ---- float32 path (direct-accumulation-into-output variant) ----
    mlp_f32 = YuanMLPPallas(hidden, intermediate, "silu",
                            dtype=jnp.float32, key=kw)
    out = jax.block_until_ready(mlp_f32(x))
    ref = _reference_mlp(x.reshape(-1, hidden), mlp_f32.w_up, mlp_f32.w_gate,
                         mlp_f32.w_down).reshape(x.shape)
    assert out.shape == x.shape and out.dtype == x.dtype
    np.testing.assert_allclose(np.asarray(out, dtype=np.float32),
                               np.asarray(ref, dtype=np.float32),
                               rtol=2e-5, atol=2e-5)

    # ---- bfloat16 path (f32 scratch-accumulator variant, bf16 MXU) ----
    mlp_bf16 = YuanMLPPallas(hidden, intermediate, "silu",
                             dtype=jnp.bfloat16, key=kw)
    x_bf = x.astype(jnp.bfloat16)
    out_bf = jax.block_until_ready(mlp_bf16(x_bf))
    ref_bf = _reference_mlp(x_bf.reshape(-1, hidden), mlp_bf16.w_up,
                            mlp_bf16.w_gate, mlp_bf16.w_down,
                            gate_round_dtype=jnp.bfloat16).reshape(x.shape)
    assert out_bf.shape == x.shape and out_bf.dtype == jnp.bfloat16
    np.testing.assert_allclose(np.asarray(out_bf, dtype=np.float32),
                               np.asarray(ref_bf, dtype=np.float32),
                               rtol=2e-2, atol=2e-2)

    # ---- standalone functional entry point ----
    out_fn = jax.block_until_ready(
        yuan_mlp(x, mlp_f32.w_up, mlp_f32.w_gate, mlp_f32.w_down))
    np.testing.assert_allclose(np.asarray(out_fn, dtype=np.float32),
                               np.asarray(ref, dtype=np.float32),
                               rtol=2e-5, atol=2e-5)

    print("KERNEL_OK")
</pallas_src>

<mosaic_0001>
module attributes {stable_mosaic.version = 11 : i64} {
  func.func @_yuan_mlp_kernel_f32out(%arg0: i32, %arg1: i32, %arg2: memref<16x32xf32, #tpu.memory_space<vmem>>, %arg3: memref<1x32x256xf32, #tpu.memory_space<vmem>>, %arg4: memref<1x128x32xf32, #tpu.memory_space<vmem>>, %arg5: memref<16x32xf32, #tpu.memory_space<vmem>>) attributes {dimension_semantics = [#tpu.dimension_semantics<parallel>, #tpu.dimension_semantics<arbitrary>], iteration_bounds = array<i64: 1, 1>, scalar_prefetch = 0 : i64, scratch_operands = 0 : i64, tpu.core_type = #tpu.core_type<tc>, window_params = [{transform_indices = @transform_0, window_bounds = array<i64: 16, 32>}, {transform_indices = @transform_1, window_bounds = array<i64: 1, 32, 256>}, {transform_indices = @transform_2, window_bounds = array<i64: 1, 128, 32>}, {transform_indices = @transform_3, window_bounds = array<i64: 16, 32>}]} {
    %c0 = arith.constant 0 : index
    %c0_0 = arith.constant 0 : index
    %0 = vector.load %arg2[%c0, %c0_0] : memref<16x32xf32, #tpu.memory_space<vmem>>, vector<16x32xf32>
    %c0_1 = arith.constant 0 : index
    %c0_2 = arith.constant 0 : index
    %c0_3 = arith.constant 0 : index
    %1 = vector.load %arg3[%c0_1, %c0_2, %c0_3] : memref<1x32x256xf32, #tpu.memory_space<vmem>>, vector<1x32x256xf32>
    %2 = vector.shape_cast %1 : vector<1x32x256xf32> to vector<32x256xf32>
    %cst = arith.constant dense<0.000000e+00> : vector<16x256xf32>
    %3 = tpu.matmul %0, %2, %cst {dimension_numbers = #tpu.dot_dimension_numbers<[1], [0], [0], [1], [0, 0, 1, 1], [], []>} : vector<16x32xf32>, vector<32x256xf32>, vector<16x256xf32> -> vector<16x256xf32>
    %4 = vector.extract_strided_slice %3 {offsets = [0, 0], sizes = [16, 128], strides = [1, 1]} : vector<16x256xf32> to vector<16x128xf32>
    %5 = vector.extract_strided_slice %3 {offsets = [0, 128], sizes = [16, 128], strides = [1, 1]} : vector<16x256xf32> to vector<16x128xf32>
    %6 = arith.negf %4 : vector<16x128xf32>
    %7 = math.exp %6 : vector<16x128xf32>
    %cst_4 = arith.constant 1.000000e+00 : f32
    %8 = vector.broadcast %cst_4 : f32 to vector<16x128xf32>
    %9 = arith.addf %8, %7 : vector<16x128xf32>
    %10 = arith.divf %8, %9 : vector<16x128xf32>
    %11 = arith.mulf %4, %10 : vector<16x128xf32>
    %12 = arith.mulf %5, %11 : vector<16x128xf32>
    %c0_5 = arith.constant 0 : index
    %c0_6 = arith.constant 0 : index
    %c0_7 = arith.constant 0 : index
    %13 = vector.load %arg4[%c0_5, %c0_6, %c0_7] : memref<1x128x32xf32, #tpu.memory_space<vmem>>, vector<1x128x32xf32>
    %14 = vector.shape_cast %13 : vector<1x128x32xf32> to vector<128x32xf32>
    %cst_8 = arith.constant dense<0.000000e+00> : vector<16x32xf32>
    %15 = tpu.matmul %12, %14, %cst_8 {dimension_numbers = #tpu.dot_dimension_numbers<[1], [0], [0], [1], [0, 0, 1, 1], [], []>} : vector<16x128xf32>, vector<128x32xf32>, vector<16x32xf32> -> vector<16x32xf32>
    %c0_i32 = arith.constant 0 : i32
    %16 = arith.cmpi eq, %arg1, %c0_i32 : i32
    %17 = arith.extui %16 : i1 to i32
    %c0_i32_9 = arith.constant 0 : i32
    %18 = arith.cmpi ne, %17, %c0_i32_9 : i32
    scf.if %18 {
      %c0_12 = arith.constant 0 : index
      %c0_13 = arith.constant 0 : index
      %22 = vector.load %arg5[%c0_12, %c0_13] : memref<16x32xf32, #tpu.memory_space<vmem>>, vector<16x32xf32>
      tpu.vector_store %arg5[%c0_12, %c0_13], %15 {strides = array<i32>} : memref<16x32xf32, #tpu.memory_space<vmem>>, vector<16x32xf32>,
    } else {
    }
    %c0_i32_10 = arith.constant 0 : i32
    %19 = arith.cmpi sgt, %arg1, %c0_i32_10 : i32
    %20 = arith.extui %19 : i1 to i32
    %c0_i32_11 = arith.constant 0 : i32
    %21 = arith.cmpi ne, %20, %c0_i32_11 : i32
    scf.if %21 {
      %c0_12 = arith.constant 0 : index
      %c0_13 = arith.constant 0 : index
      %22 = vector.load %arg5[%c0_12, %c0_13] : memref<16x32xf32, #tpu.memory_space<vmem>>, vector<16x32xf32>
      %23 = arith.addf %22, %15 : vector<16x32xf32>
      %c0_14 = arith.constant 0 : index
      %c0_15 = arith.constant 0 : index
      %24 = vector.load %arg5[%c0_14, %c0_15] : memref<16x32xf32, #tpu.memory_space<vmem>>, vector<16x32xf32>
      tpu.vector_store %arg5[%c0_14, %c0_15], %23 {strides = array<i32>} : memref<16x32xf32, #tpu.memory_space<vmem>>, vector<16x32xf32>,
    } else {
    }
    return
  }
  func.func @transform_0(%arg0: i32, %arg1: i32) -> (i32, i32) {
    %c0_i32 = arith.constant 0 : i32
    %c0_i32_0 = arith.constant 0 : i32
    return %arg0, %c0_i32 : i32, i32
  }
  func.func @transform_1(%arg0: i32, %arg1: i32) -> (i32, i32, i32) {
    %c0_i32 = arith.constant 0 : i32
    %c0_i32_0 = arith.constant 0 : i32
    %c0_i32_1 = arith.constant 0 : i32
    return %arg1, %c0_i32, %c0_i32_0 : i32, i32, i32
  }
  func.func @transform_2(%arg0: i32, %arg1: i32) -> (i32, i32, i32) {
    %c0_i32 = arith.constant 0 : i32
    %c0_i32_0 = arith.constant 0 : i32
    %c0_i32_1 = arith.constant 0 : i32
    return %arg1, %c0_i32, %c0_i32_0 : i32, i32, i32
  }
  func.func @transform_3(%arg0: i32, %arg1: i32) -> (i32, i32) {
    %c0_i32 = arith.constant 0 : i32
    %c0_i32_0 = arith.constant 0 : i32
    return %arg0, %c0_i32 : i32, i32
  }
}

</mosaic_0001>

<bundles_post_ra>
// kernel: tpu_custom_call.1
= control target key start
LH: loop header
LB: loop body
LE: loop exit
PB: predicated region body
PF: predicated region fallthrough
CT: control target
= control target key end

     0   :  { %v339_v4 = vmov 0.0   ;;  %s448_s0 = inlined_call_operand.vmem [shape: f32[16,32], index: 0, kind: input, shape index: {}]   ;;  %s449_s1 = inlined_call_operand.vmem [shape: f32[1,32,256], index: 1, kind: input, shape index: {}]   ;;  %s450_s2 = inlined_call_operand.vmem [shape: f32[1,128,32], index: 2, kind: input, shape index: {}]   ;;  %s451_s3 = inlined_call_operand.hbm [shape: f32[16,32], index: 3, kind: output, shape index: {}]  }
   0x1   :  { %v24_v0 = vld [vmem:[%s449_s1 + $0x38] sm:$0xff]  ;;  %v23_v1 = vld [vmem:[%s449_s1 + $0x30] sm:$0xff]  ;;  %v22_v2 = vld [vmem:[%s449_s1 + $0x28] sm:$0xff]  ;;  %96 = vmatprep.mubr.f32.mxu0 %v339_v4 }
   0x2   :  { %56 = vmatprep.subr.mxu0 %v24_v0  ;;  %v21_v3 = vld [vmem:[%s449_s1 + $0x20] sm:$0xff]  ;;  %v20_v5 = vld [vmem:[%s449_s1 + $0x18] sm:$0xff]  ;;  %v19_v6 = vld [vmem:[%s449_s1 + $0x10] sm:$0xff] }
   0x3   :  { %57 = vmatpush1.msra.mxu0 %v23_v1 }
   0x4   :  { %58 = vmatprep.subr.mxu0 %v22_v2 }
   0x5   :  { %8 = vsyncpa [#allocation3], 0  ;;  %59 = vmatpush1.msra.mxu0 %v21_v3  ;;  %v18_v7 = vld [vmem:[%s449_s1 + $0x8] sm:$0xff]  ;;  %v17_v8 = vld [vmem:[%s449_s1] sm:$0xff]  ;;  %vm25_vm0 = vcmask 261120  }
   0x6   :  { %60 = vmatprep.subr.mxu0 %v20_v5  ;;  %v15_v9 = vld [vmem:[%s448_s0] sm:$0xff]  ;;  %v16_v10 = vld [vmem:[%s448_s0 + $0x8] sm:$0xff]  ;;  %v140_v11 = vld [vmem:[%s450_s2 + $0x78] sm:$0xff] }
   0x7   :  { %61 = vmatpush1.msra.mxu0 %v19_v6  ;;  %270 = vmatprep.subr.mxu1 %v140_v11  ;;  %v139_v12 = vld [vmem:[%s450_s2 + $0x70] sm:$0xff]  ;;  %v138_v13 = vld [vmem:[%s450_s2 + $0x68] sm:$0xff]  ;;  %v137_v14 = vld [vmem:[%s450_s2 + $0x60] sm:$0xff] }
   0x8   :  { %62 = vmatprep.subr.mxu0 %v18_v7  ;;  %271 = vmatpush3.msra.mxu1 %v140_v11  ;;  %v136_v15 = vld [vmem:[%s450_s2 + $0x58] sm:$0xff]  ;;  %v135_v16 = vld [vmem:[%s450_s2 + $0x50] sm:$0xff]  ;;  %v134_v17 = vld [vmem:[%s450_s2 + $0x48] sm:$0xff] }
   0x9   :  { %63 = vmatpush1.msra.mxu0 %v17_v8  ;;  %272 = vmatprep.subr.mxu1 %v139_v12  ;;  %v133_v18 = vld [vmem:[%s450_s2 + $0x40] sm:$0xff]  ;;  %v132_v19 = vld [vmem:[%s450_s2 + $0x38] sm:$0xff]  ;;  %v131_v20 = vld [vmem:[%s450_s2 + $0x30] sm:$0xff] }
   0xa   :  { %248 = vmatmul.mubr.msk.f32.vlgmr.msra.gmra.mxu0 %vm25_vm0, %v15_v9  ;;  %273 = vmatpush3.msra.mxu1 %v139_v12  ;;  %v130_v21 = vld [vmem:[%s450_s2 + $0x28] sm:$0xff]  ;;  %v129_v22 = vld [vmem:[%s450_s2 + $0x20] sm:$0xff]  ;;  %v128_v23 = vld [vmem:[%s450_s2 + $0x18] sm:$0xff] }
   0xb   :  { %102 = vmatprep.mubr.f32.mxu0 %v339_v4  ;;  %274 = vmatprep.subr.mxu1 %v138_v13  ;;  %v127_v24 = vld [vmem:[%s450_s2 + $0x10] sm:$0xff]  ;;  %v126_v25 = vld [vmem:[%s450_s2 + $0x8] sm:$0xff]  ;;  %v125_v26 = vld [vmem:[%s450_s2] sm:$0xff]  ;;  %s340_s2 = smov [#allocation2]  }
   0xc   :  { %275 = vmatpush3.msra.mxu1 %v138_v13  ;;  %s237_s7 = sshll.u32 %s340_s2, 4  ;;  %s238_s7 = int_to_ptr.vmem [resolvable:$true] %s237_s7 }
   0xd   :  { %276 = vmatprep.subr.mxu1 %v137_v14  ;;  %s317_s8 = scalar_lea.vmem %s238_s7, 256  ;;  %p322_p1 = scmp.lt.s32.totalorder %s238_s7, %s238_s7 }
   0xe   :  { %249 = vmatmul.mubr.msk.f32.gmra.mxu0 %vm25_vm0, %v16_v10  ;;  %277 = vmatpush3.msra.mxu1 %v137_v14  ;;  %p318_p0 = scmp.ne.s32.totalorder %s238_s7, %s317_s8  ;;  %p323_p2 = scmp.lt.s32.totalorder %s317_s8, %s317_s8 }
   0xf   :  { %278 = vmatprep.subr.mxu1 %v136_v15 }
  0x10   :  { %279 = vmatpush3.msra.mxu1 %v136_v15  ;;  %p324_p3 = por %p323_p2, %p322_p1 }
  0x11   :  { %280 = vmatprep.subr.mxu1 %v135_v16 }
  0x12   :  { %281 = vmatpush3.msra.mxu1 %v135_v16  ;;  %p325_p4 = pnand %p324_p3, %p318_p0 }
  0x13   :  { %282 = vmatprep.subr.mxu1 %v134_v17 }
  0x14   :  { %283 = vmatpush3.msra.mxu1 %v134_v17 }
  0x15   :  { %284 = vmatprep.subr.mxu1 %v133_v18 }
  0x16   :  { %285 = vmatpush3.msra.mxu1 %v133_v18 }
  0x17   :  { %286 = vmatprep.subr.mxu1 %v132_v19 }
  0x18   :  { %287 = vmatpush3.msra.mxu1 %v132_v19 }
  0x19   :  { %288 = vmatprep.subr.mxu1 %v131_v20 }
  0x1a   :  { %289 = vmatpush3.msra.mxu1 %v131_v20 }
  0x1b   :  { %290 = vmatprep.subr.mxu1 %v130_v21 }
  0x1c   :  { %291 = vmatpush3.msra.mxu1 %v130_v21 }
  0x1d   :  { %292 = vmatprep.subr.mxu1 %v129_v22 }
  0x1e   :  { %293 = vmatpush3.msra.mxu1 %v129_v22 }
  0x1f   :  { %294 = vmatprep.subr.mxu1 %v128_v23 }
  0x20   :  { %295 = vmatpush3.msra.mxu1 %v128_v23 }
  0x21   :  { %296 = vmatprep.subr.mxu1 %v127_v24 }
  0x22   :  { %297 = vmatpush3.msra.mxu1 %v127_v24 }
  0x23   :  { %298 = vmatprep.subr.mxu1 %v126_v25 }
  0x24   :  { %299 = vmatpush3.msra.mxu1 %v126_v25 }
  0x25   :  { %300 = vmatprep.subr.mxu1 %v125_v26 }
  0x26   :  { %301 = vmatpush3.msra.mxu1 %v125_v26 }
  0xca   :  { %v98_v27 = vpop.f32.mrf.mxu0 }
  0xcb   :  { %v250_v28 = vmul.f32 -1.442695, %v98_v27 }
  0xcc   :  { %v100_v29 = vpop.f32.mrf.mxu0 }
  0xcd   :  { %309 = vpow2.f32 %v250_v28 }
  0xce   :  { %v104_v30 = vpop.f32.mrf.mxu0 }
  0xcf   :  { %v251_v31 = vmul.f32 -1.442695, %v104_v30 }
  0xd0   :  { %v106_v41 = vpop.f32.mrf.mxu0 }
  0xd1   :  { %311 = vpow2.f32 %v251_v31 }
  0xda   :  { %v310_v32 = vpop.eup %309 }
  0xdb   :  { %v115_v33 = vadd.f32 1.0, %v310_v32 }
  0xdd   :  { %313 = vrcp.f32 %v115_v33 }
  0xde   :  { %v312_v34 = vpop.eup %311 }
  0xdf   :  { %v116_v35 = vadd.f32 1.0, %v312_v34 }
  0xe1   :  { %315 = vrcp.f32 %v116_v35 }
  0xea   :  { %v314_v36 = vpop.eup %313 }
  0xeb   :  { %v121_v37 = vmul.f32 %v314_v36, %v98_v27 }
  0xed   :  { %v123_v38 = vmul.f32 %v121_v37, %v100_v29 }
  0xee   :  { %v316_v39 = vpop.eup %315 }
  0xef   :  { %v122_v40 = vmul.f32 %v316_v39, %v104_v30  ;;  %302 = vmatprep.mubr.f32.mxu1 %v123_v38 }
  0xf1   :  { %v124_v42 = vmul.f32 %v122_v40, %v106_v41 }
  0xf3   :  { %303 = vmatmul.mubr.f32.vlgmr.msra.gmra.mxu1 %v124_v42 }
 0x1b3   :  { %v304_v43 = vpop.f32.mrf.mxu1 }
 0x1b4   :  { %221 = vst.msk [vmem:[#allocation2 + $0x8] sm:$0xff] %vm25_vm0, %v304_v43 }
 0x1b5   :  { %v207_v44 = vpop.f32.mrf.mxu1 }
 0x1b6   :  { %220 = vst.msk [vmem:[#allocation2] sm:$0xff] %vm25_vm0, %v207_v44 }
 0x1b7   :  { %328 = shalt.err (!%p325_p4)
}
 0x1b8   :  { %s341_s9 = smov 128   ;;  %s342_s0 = smov 8  }
 0x1b9   :  { %243 = dma.vmem_to_hbm [thread:$0]  %s238_s7, 256, %s451_s3, [#allocation3], %s341_s9, %s341_s9, %s342_s0  }
 0x1ba   :  { %337 = dma.done.wait [#allocation3], 256  }
 0x1bb   :  { %338 = vsyncadd [#allocation3], 4294967040 }
 0x1bc   :  { %247 = vsyncpa [#allocation3], 1 }

</bundles_post_ra>
